<compile_context>
chip_gen: v7x
topology: tpu7x:2x2x1
jax: 0.10.0
libtpu: 0.0.40
codegen_flags: <defaults>
</compile_context>

<pallas_src>
import jax
import jax.numpy as jnp
from jax.experimental import pallas as pl
from jax.experimental.pallas import tpu as pltpu

EPS = 1e-6
LANES = 128
SUBLANES = 8
TILE_BYTES = 4 << 20          # native-dtype bytes per input tile per stream
VMEM_LIMIT_BYTES = 40 << 20   # 2 streams x 2 buffers x 4 MiB + output + slack


def _round_up(v, m):
    return ((v + m - 1) // m) * m


def _make_kernel(n_valid, block_rows, num_blocks):
    # Mask is needed iff the grid covers more elements than are valid
    # (either wrapper padding to a vreg multiple, or a ragged last block).
    needs_mask = n_valid != num_blocks * block_rows * LANES

    def kernel(x_ref, y_ref, o_ref):
        d = x_ref[...].astype(jnp.float32) - y_ref[...].astype(jnp.float32)
        err = jnp.sqrt(d * d + EPS)

        def reduce_and_store(e):
            # Fold rows in groups of 8 -> (8, 128) vreg-shaped partial sum.
            # Pure VPU vreg adds; no cross-lane reduce, no masked scalar store.
            o_ref[...] = e.reshape(block_rows // SUBLANES, SUBLANES, LANES).sum(axis=0)

        if needs_mask:
            i = pl.program_id(0)

            @pl.when(i == num_blocks - 1)
            def _():
                # Global flat element index of every element in the last block.
                row = jax.lax.broadcasted_iota(jnp.int32, (block_rows, LANES), 0)
                col = jax.lax.broadcasted_iota(jnp.int32, (block_rows, LANES), 1)
                base = (num_blocks - 1) * block_rows * LANES  # static int
                gidx = base + row * LANES + col
                # Padding zeros and uninitialized out-of-bounds VMEM both land
                # at gidx >= n_valid and are dropped by the elementwise select.
                reduce_and_store(jnp.where(gidx < n_valid, err, 0.0))

            @pl.when(i != num_blocks - 1)
            def _():
                reduce_and_store(err)
        else:
            reduce_and_store(err)

    return kernel


@jax.jit
def l1_charbonnier_loss(x, y):
    assert x.shape == y.shape
    n_valid = x.size

    xf = x.reshape(-1)
    yf = y.reshape(-1)

    # Pad only up to one vreg (8 * 128 elements). For typical image-sized
    # tensors this is a no-op, so both inputs are streamed straight from their
    # original HBM buffers (no extra full-array copy). The in-kernel mask
    # removes the padded elements' contribution.
    n_pad = (-n_valid) % (SUBLANES * LANES)
    if n_pad:
        xf = jnp.pad(xf, (0, n_pad))
        yf = jnp.pad(yf, (0, n_pad))

    rows = xf.size // LANES  # always a multiple of SUBLANES, >= SUBLANES
    x2 = xf.reshape(rows, LANES)
    y2 = yf.reshape(rows, LANES)

    # Dtype-aware tile size: ~TILE_BYTES of native-dtype input per stream per
    # pipeline buffer (8192 rows f32, 16384 rows bf16), multiple of 8 sublanes.
    itemsize = jnp.dtype(x.dtype).itemsize
    max_block_rows = max(
        SUBLANES, (TILE_BYTES // (LANES * itemsize)) // SUBLANES * SUBLANES
    )
    # Prefer >= 2 grid blocks so the "parallel" axis spans both TensorCores
    # on v7x (megacore sharding) whenever the input is big enough.
    half_rows = _round_up(max(rows // 2, 1), SUBLANES)
    block_rows = min(max_block_rows, max(SUBLANES, half_rows))
    num_blocks = -(-rows // block_rows)

    tile_spec = pl.BlockSpec((block_rows, LANES), lambda i: (i, 0))

    partials = pl.pallas_call(
        _make_kernel(n_valid, block_rows, num_blocks),
        out_shape=jax.ShapeDtypeStruct((num_blocks * SUBLANES, LANES), jnp.float32),
        grid_spec=pltpu.PrefetchScalarGridSpec(
            num_scalar_prefetch=0,
            grid=(num_blocks,),
            in_specs=[tile_spec, tile_spec],
            out_specs=pl.BlockSpec((SUBLANES, LANES), lambda i: (i, 0)),
        ),
        compiler_params=pltpu.CompilerParams(
            dimension_semantics=("parallel",),
            vmem_limit_bytes=VMEM_LIMIT_BYTES,
        ),
    )(x2, y2)

    # Tiny epilogue (fused by jit): sum per-block (8, 128) partials, normalize
    # by the true element count. Returned in float32 (accumulation dtype).
    return jnp.sum(partials) / jnp.float32(n_valid)


def _ref_loss(x, y):
    return jnp.mean(jnp.sqrt((x.astype(jnp.float32) - y.astype(jnp.float32)) ** 2 + EPS))


if __name__ == "__main__":
    key = jax.random.PRNGKey(0)

    # Main case: NCHW input like the PyTorch module expects (aligned, 2 blocks).
    kx, ky, key = (*jax.random.split(key, 2), key)
    shape = (2, 4, 16, 16)
    x = jax.random.normal(kx, shape, dtype=jnp.float32)
    y = jax.random.normal(ky, shape, dtype=jnp.float32)
    loss = l1_charbonnier_loss(x, y)
    jax.block_until_ready(loss)
    ref = _ref_loss(x, y)
    assert jnp.allclose(loss, ref, rtol=1e-5, atol=1e-6), (loss, ref)

    # Unaligned size: exercises the wrapper vreg-pad + in-kernel tail mask.
    kx2, ky2 = jax.random.split(jax.random.PRNGKey(1))
    xs = jax.random.normal(kx2, (3, 3, 7, 5), dtype=jnp.float32)
    ys = jax.random.normal(ky2, (3, 3, 7, 5), dtype=jnp.float32)
    loss2 = l1_charbonnier_loss(xs, ys)
    jax.block_until_ready(loss2)
    assert jnp.allclose(loss2, _ref_loss(xs, ys), rtol=1e-5, atol=1e-6)

    # Ragged last block (rows not divisible by block_rows): garbage rows masked.
    kx3, ky3 = jax.random.split(jax.random.PRNGKey(2))
    xr = jax.random.normal(kx3, (3, 8, 128), dtype=jnp.float32)
    yr = jax.random.normal(ky3, (3, 8, 128), dtype=jnp.float32)
    loss3 = l1_charbonnier_loss(xr, yr)
    jax.block_until_ready(loss3)
    assert jnp.allclose(loss3, _ref_loss(xr, yr), rtol=1e-5, atol=1e-6)

    print("KERNEL_OK")
</pallas_src>

<mosaic_0001>
module attributes {stable_mosaic.version = 11 : i64} {
  func.func @kernel(%arg0: i32, %arg1: memref<8x128xf32, #tpu.memory_space<vmem>>, %arg2: memref<8x128xf32, #tpu.memory_space<vmem>>, %arg3: memref<8x128xf32, #tpu.memory_space<vmem>>) attributes {dimension_semantics = [#tpu.dimension_semantics<parallel>], iteration_bounds = array<i64: 2>, scalar_prefetch = 0 : i64, scratch_operands = 0 : i64, tpu.core_type = #tpu.core_type<tc>, window_params = [{transform_indices = @transform_0, window_bounds = array<i64: 8, 128>}, {transform_indices = @transform_1, window_bounds = array<i64: 8, 128>}, {transform_indices = @transform_2, window_bounds = array<i64: 8, 128>}]} {
    %c0 = arith.constant 0 : index
    %c0_0 = arith.constant 0 : index
    %0 = vector.load %arg1[%c0, %c0_0] : memref<8x128xf32, #tpu.memory_space<vmem>>, vector<8x128xf32>
    %c0_1 = arith.constant 0 : index
    %c0_2 = arith.constant 0 : index
    %1 = vector.load %arg2[%c0_1, %c0_2] : memref<8x128xf32, #tpu.memory_space<vmem>>, vector<8x128xf32>
    %2 = arith.subf %0, %1 : vector<8x128xf32>
    %3 = arith.mulf %2, %2 : vector<8x128xf32>
    %cst = arith.constant 9.99999997E-7 : f32
    %4 = vector.broadcast %cst : f32 to vector<8x128xf32>
    %5 = arith.addf %3, %4 : vector<8x128xf32>
    %6 = math.sqrt %5 : vector<8x128xf32>
    %7 = vector.shape_cast %6 : vector<8x128xf32> to vector<1x8x128xf32>
    %cst_3 = arith.constant dense<0.000000e+00> : vector<8x128xf32>
    %8 = vector.multi_reduction <add>, %7, %cst_3 [0] : vector<1x8x128xf32> to vector<8x128xf32>
    %c0_4 = arith.constant 0 : index
    %c0_5 = arith.constant 0 : index
    %9 = vector.load %arg3[%c0_4, %c0_5] : memref<8x128xf32, #tpu.memory_space<vmem>>, vector<8x128xf32>
    tpu.vector_store %arg3[%c0_4, %c0_5], %8 {strides = array<i32>} : memref<8x128xf32, #tpu.memory_space<vmem>>, vector<8x128xf32>,
    return
  }
  func.func @transform_0(%arg0: i32) -> (i32, i32) {
    %c0_i32 = arith.constant 0 : i32
    %c0_i32_0 = arith.constant 0 : i32
    return %arg0, %c0_i32 : i32, i32
  }
  func.func @transform_1(%arg0: i32) -> (i32, i32) {
    %c0_i32 = arith.constant 0 : i32
    %c0_i32_0 = arith.constant 0 : i32
    return %arg0, %c0_i32 : i32, i32
  }
  func.func @transform_2(%arg0: i32) -> (i32, i32) {
    %c0_i32 = arith.constant 0 : i32
    %c0_i32_0 = arith.constant 0 : i32
    return %arg0, %c0_i32 : i32, i32
  }
}

</mosaic_0001>

<bundles_post_ra>
// kernel: l1_charbonnier_loss.1
= control target key start
LH: loop header
LB: loop body
LE: loop exit
PB: predicated region body
PF: predicated region fallthrough
CT: control target
= control target key end

     0   :  { %s278_s9 = smov 0   ;;  %s298_s0 = inlined_call_operand.vmem [shape: f32[16,128], index: 0, kind: input, shape index: {}]   ;;  %s299_s1 = inlined_call_operand.vmem [shape: f32[16,128], index: 1, kind: input, shape index: {}]   ;;  %s300_s2 = inlined_call_operand.vmem [shape: f32[16,128], index: 2, kind: output, shape index: {}]  }
   0x1 LB: > { %s235_s10 = sadd.s32 4294967295, %s261_s9   ;;  %p239_p0 = scmp.ge.s32.totalorder %s261_s9, 1  ;;  %s261_s9 = sphi %s278_s9, %s12_s9  }
   0x2   : > { %p120_p1 = scmp.lt.s32.totalorder %s261_s9, 3 }
   0x4   : > { %p121_p2 = pnand %p239_p0, %p120_p1 }
   0x5   : > { %p144_p3 = scmp.lt.s32.totalorder (!%p121_p2), %s235_s10, 1 }
   0x6   : > { %124 = sbr.rel (%p121_p2) target bundleno = 40 (0x28), region = 28 }
   0xd   : > { %s302_s10 = smov (!%p144_p3, %s235_s10), 1 }
   0xe   : > { %s240_s11 = sshll.u32 %s302_s10, 3 }
   0xf   : > { %s147_s14 = scalar_lea.vmem %s298_s0, %s240_s11  ;;  %s151_s17 = scalar_lea.vmem %s299_s1, %s240_s11 }
  0x10   : > { %v156_v0 = vld [vmem:[%s147_s14] sm:$0xff]  ;;  %s155_s20 = scalar_lea.vmem %s300_s2, %s240_s11 }
  0x11   : > { %v157_v1 = vld [vmem:[%s151_s17] sm:$0xff] }
  0x12   : > { %v158_v2 = vsub.f32 %v156_v0, %v157_v1 }
  0x14   : > { %v159_v3 = vmul.f32 %v158_v2, %v158_v2 }
  0x16   : > { %v160_v4 = vadd.f32 1e-06, %v159_v3 }
  0x18   : > { %253 = vrsqrt.f32 %v160_v4  ;;  %vm163_vm0 = vcmp.eq.f32.partialorder %v160_v4, inf  ;;  %v166_v6 = vand.u32 2147483648, %v160_v4  ;;  %vm165_vm1 = vcmp.eq.f32.partialorder %v160_v4, 0.0 }
  0x22   : > { %v254_v5 = vpop.eup %253 }
  0x23   : > { %v162_v7 = vmul.f32 %v254_v5, %v160_v4 }
  0x25   : > { %v164_v8 = vsel %vm163_vm0, %v160_v4, %v162_v7 }
  0x26   : > { %v167_v9 = vsel %vm165_vm1, %v166_v6, %v164_v8 }
  0x27   : > { %169 = vst [vmem:[%s155_s20] sm:$0xff] %v167_v9 }
  0x28 PF: > { %s12_s9 = sadd.s32 1, %s261_s9  }
  0x29   : > { %p9_p4 = scmp.ge.s32.totalorder %s12_s9, 4  }
  0x2b   :  { %11 = sbr.rel (!%p9_p4) target bundleno = 1 (0x1), region = 61 }

</bundles_post_ra>
